<compile_context>
chip_gen: v6e
topology: v6e:2x2x1
jax: 0.10.0
libtpu: 0.0.40
codegen_flags: <defaults>
</compile_context>

<pallas_src>
import functools

import jax
import jax.numpy as jnp
from jax.experimental import pallas as pl
from jax.experimental.pallas import tpu as pltpu


def _round_up(x, m):
    return ((x + m - 1) // m) * m


def _pad2d(a, rows, cols):
    return jnp.pad(a, ((0, rows - a.shape[0]), (0, cols - a.shape[1])))


def _pick_batch_tile(batch, max_tile=2048):
    """Adaptive batch tile: two balanced tiles (feeds both TensorCores on v7x
    via the "parallel" axis); a single tile for tiny batches."""
    rows = _round_up(max(batch, 1), 8)
    if rows < 16:
        return rows
    half = _round_up((rows + 1) // 2, 8)
    return min(half, max_tile)


# ---------------------------------------------------------------------------
# Kernel
# ---------------------------------------------------------------------------
def duel_q_kernel(x_ref,
                  w0_ref, w1_ref, w2_ref, w3_ref, wh_ref,
                  b_ref,
                  y_ref):
    """4 x (Linear+ReLU) feature MLP + fused dueling head, all lane-dense.

    Weights are bf16, zero-padded to 128-lane widths; biases are packed rows
    of the single f32 buffer b_ref (padded entries are zero).  Matmuls run on
    the MXU with f32 accumulation; bias add / ReLU stay f32 on the VPU.
    """
    h = x_ref[...]
    for li, w_ref in enumerate((w0_ref, w1_ref, w2_ref, w3_ref)):
        width = w_ref.shape[1]
        h = jnp.dot(h.astype(jnp.bfloat16), w_ref[...],
                    preferred_element_type=jnp.float32) + b_ref[li:li + 1, :width]
        h = jnp.maximum(h, 0.0)
    # TODO(synk): nn.Dropout(0.3) is identity in eval mode; training-mode
    # dropout (pltpu.prng_random_bits mask) intentionally not applied.

    head_w = wh_ref.shape[1]
    y_ref[...] = (jnp.dot(h.astype(jnp.bfloat16), wh_ref[...],
                          preferred_element_type=jnp.float32)
                  + b_ref[4:5, :head_w])


# ---------------------------------------------------------------------------
# Parameter prep (one-time, hoisted out of the forward path)
# ---------------------------------------------------------------------------
def prepare_params(params):
    """Fuse heads + zero-pad feature widths to multiples of 128 + pack biases.

    Input: [W0,b0,W1,b1,W2,b2,W3,b3,Wv,bv,Wa,ba] with W (in, out) bf16 and
    b (1, out) f32 (transpose of PyTorch's (out, in) layout).
    Returns (w0p, w1p, w2p, w3p, whp, bias_all).
    """
    w0, b0, w1, b1, w2, b2, w3, b3, wv, bv, wa, ba = params

    # Fused dueling head: cols [0, A) = advantage, col A = value.
    wh = jnp.concatenate([wa, wv], axis=1)           # (A, A+1) bf16
    bh = jnp.concatenate([ba, bv], axis=1)           # (1, A+1) f32

    weights = [w0, w1, w2, w3, wh]
    biases = [b0, b1, b2, b3, bh]

    padded_w = []
    out_pads = []
    for li, w in enumerate(weights):
        in_pad = w.shape[0] if li == 0 else _round_up(w.shape[0], 128)
        out_pad = _round_up(w.shape[1], 128)
        # Zero padding: padded bias entries and padded next-layer input rows
        # are zero, so nothing leaks through the ReLUs.
        padded_w.append(_pad2d(w, in_pad, out_pad).astype(jnp.bfloat16))
        out_pads.append(out_pad)

    max_w = max(out_pads)
    bias_all = jnp.zeros((8, max_w), jnp.float32)
    for li, b in enumerate(biases):
        bias_all = bias_all.at[li, :b.shape[1]].set(b[0].astype(jnp.float32))

    return tuple(padded_w) + (bias_all,)


# ---------------------------------------------------------------------------
# Forward
# ---------------------------------------------------------------------------
@functools.partial(jax.jit, static_argnames=("action_size",))
def duel_q_forward(x, prepared, *, action_size):
    """x: (B, state_size) f32; prepared: output of prepare_params."""
    w0, w1, w2, w3, wh, bias_all = prepared
    batch, state_size = x.shape
    head_w = wh.shape[1]                       # 128-lane padded head width

    bt = _pick_batch_tile(batch)
    padded_batch = _round_up(_round_up(batch, 8), bt)
    num_tiles = padded_batch // bt
    if padded_batch != batch:
        x = jnp.pad(x, ((0, padded_batch - batch), (0, 0)))

    def resident(arr):
        # Full-array block + constant index_map -> stays VMEM-resident.
        return pl.BlockSpec(arr.shape, lambda i: (0,) * arr.ndim)

    y = pl.pallas_call(
        duel_q_kernel,
        out_shape=jax.ShapeDtypeStruct((padded_batch, head_w), jnp.float32),
        grid=(num_tiles,),
        in_specs=[pl.BlockSpec((bt, state_size), lambda i: (i, 0))]
                 + [resident(a) for a in (w0, w1, w2, w3, wh, bias_all)],
        out_specs=pl.BlockSpec((bt, head_w), lambda i: (i, 0)),
        compiler_params=pltpu.CompilerParams(
            dimension_semantics=("parallel",)),
    )(x, w0, w1, w2, w3, wh, bias_all)

    # Dueling combine in the wrapper (fuses under jit).  torch's
    # `advantage.mean()` is a global mean over batch AND action dims, taken
    # over valid rows only (padded rows are sliced off first).
    adv = y[:batch, :action_size]
    val = y[:batch, action_size:action_size + 1]
    return val + adv - jnp.mean(adv)


# ---------------------------------------------------------------------------
# Init + pure-JAX reference
# ---------------------------------------------------------------------------
def init_params(key, state_size, action_size):
    """PyTorch-style init: U(-1/sqrt(fan_in), 1/sqrt(fan_in)).

    Weights stored (in_features, out_features) in bf16; biases (1, out) f32.
    """
    layer_sizes = [state_size,
                   state_size * state_size,
                   state_size * state_size * action_size,
                   action_size * state_size,
                   action_size]
    dims = [(layer_sizes[l], layer_sizes[l + 1])
            for l in range(len(layer_sizes) - 1)]
    dims.append((layer_sizes[-1], 1))             # value head
    dims.append((layer_sizes[-1], action_size))   # advantage head

    params = []
    for fan_in, fan_out in dims:
        key, kw, kb = jax.random.split(key, 3)
        bound = 1.0 / float(fan_in) ** 0.5
        w = jax.random.uniform(kw, (fan_in, fan_out), jnp.float32, -bound, bound)
        b = jax.random.uniform(kb, (1, fan_out), jnp.float32, -bound, bound)
        params.append((w.astype(jnp.bfloat16), b))

    (w0, b0), (w1, b1), (w2, b2), (w3, b3), (wv, bv), (wa, ba) = params
    return [w0, b0, w1, b1, w2, b2, w3, b3, wv, bv, wa, ba]


def reference_forward(x, params):
    """Pure-JAX reference (same bf16-matmul / f32-accumulate recipe)."""
    w0, b0, w1, b1, w2, b2, w3, b3, wv, bv, wa, ba = params
    h = x
    for w, b in [(w0, b0), (w1, b1), (w2, b2), (w3, b3)]:
        h = jnp.maximum(
            jnp.dot(h.astype(jnp.bfloat16), w,
                    preferred_element_type=jnp.float32) + b, 0.0)
    adv = jnp.dot(h.astype(jnp.bfloat16), wa,
                  preferred_element_type=jnp.float32) + ba
    val = jnp.dot(h.astype(jnp.bfloat16), wv,
                  preferred_element_type=jnp.float32) + bv
    return val + adv - jnp.mean(adv)


if __name__ == "__main__":
    state_size = 8
    action_size = 4

    key = jax.random.PRNGKey(0)
    key, kp = jax.random.split(key)
    params = init_params(kp, state_size, action_size)
    prepared = prepare_params(params)   # one-time: fuse heads, pad, pack biases

    # batch=2: single padded 8-row tile.  batch=256: two 128-row tiles
    # (shards across both TensorCores on v7x via the "parallel" axis).
    for batch in (2, 256):
        key, kx = jax.random.split(key)
        x = jax.random.normal(kx, (batch, state_size), jnp.float32)

        out = jax.block_until_ready(
            duel_q_forward(x, prepared, action_size=action_size))
        ref = reference_forward(x, params)

        assert out.shape == (batch, action_size), out.shape
        assert jnp.allclose(out, ref, atol=2e-3, rtol=2e-3), (out, ref)

    print("KERNEL_OK")
</pallas_src>

<mosaic_0001>
module attributes {stable_mosaic.version = 11 : i64} {
  func.func @duel_q_kernel(%arg0: i32, %arg1: memref<8x8xf32, #tpu.memory_space<vmem>>, %arg2: memref<8x128xbf16, #tpu.memory_space<vmem>>, %arg3: memref<128x256xbf16, #tpu.memory_space<vmem>>, %arg4: memref<256x128xbf16, #tpu.memory_space<vmem>>, %arg5: memref<128x128xbf16, #tpu.memory_space<vmem>>, %arg6: memref<128x128xbf16, #tpu.memory_space<vmem>>, %arg7: memref<8x256xf32, #tpu.memory_space<vmem>>, %arg8: memref<8x128xf32, #tpu.memory_space<vmem>>) attributes {dimension_semantics = [#tpu.dimension_semantics<parallel>], iteration_bounds = array<i64: 1>, scalar_prefetch = 0 : i64, scratch_operands = 0 : i64, tpu.core_type = #tpu.core_type<tc>, window_params = [{transform_indices = @transform_0, window_bounds = array<i64: 8, 8>}, {pipeline_mode = #tpu.pipeline_mode<synchronous>, transform_indices = @transform_1, window_bounds = array<i64: 8, 128>}, {pipeline_mode = #tpu.pipeline_mode<synchronous>, transform_indices = @transform_2, window_bounds = array<i64: 128, 256>}, {pipeline_mode = #tpu.pipeline_mode<synchronous>, transform_indices = @transform_3, window_bounds = array<i64: 256, 128>}, {pipeline_mode = #tpu.pipeline_mode<synchronous>, transform_indices = @transform_4, window_bounds = array<i64: 128, 128>}, {pipeline_mode = #tpu.pipeline_mode<synchronous>, transform_indices = @transform_5, window_bounds = array<i64: 128, 128>}, {pipeline_mode = #tpu.pipeline_mode<synchronous>, transform_indices = @transform_6, window_bounds = array<i64: 8, 256>}, {transform_indices = @transform_7, window_bounds = array<i64: 8, 128>}]} {
    %c0 = arith.constant 0 : index
    %c0_0 = arith.constant 0 : index
    %0 = vector.load %arg1[%c0, %c0_0] : memref<8x8xf32, #tpu.memory_space<vmem>>, vector<8x8xf32>
    %1 = arith.truncf %0 : vector<8x8xf32> to vector<8x8xbf16>
    %c0_1 = arith.constant 0 : index
    %c0_2 = arith.constant 0 : index
    %2 = vector.load %arg2[%c0_1, %c0_2] : memref<8x128xbf16, #tpu.memory_space<vmem>>, vector<8x128xbf16>
    %cst = arith.constant dense<0.000000e+00> : vector<8x128xf32>
    %3 = tpu.matmul %1, %2, %cst {dimension_numbers = #tpu.dot_dimension_numbers<[1], [0], [0], [1], [0, 0, 1, 1], [], []>} : vector<8x8xbf16>, vector<8x128xbf16>, vector<8x128xf32> -> vector<8x128xf32>
    %c0_3 = arith.constant 0 : index
    %c0_4 = arith.constant 0 : index
    %4 = vector.load %arg7[%c0_3, %c0_4] : memref<8x256xf32, #tpu.memory_space<vmem>>, vector<1x128xf32>
    %5 = vector.broadcast %4 : vector<1x128xf32> to vector<8x128xf32>
    %6 = arith.addf %3, %5 : vector<8x128xf32>
    %cst_5 = arith.constant 0.000000e+00 : f32
    %7 = vector.broadcast %cst_5 : f32 to vector<8x128xf32>
    %8 = arith.maximumf %6, %7 : vector<8x128xf32>
    %9 = arith.truncf %8 : vector<8x128xf32> to vector<8x128xbf16>
    %c0_6 = arith.constant 0 : index
    %c0_7 = arith.constant 0 : index
    %10 = vector.load %arg3[%c0_6, %c0_7] : memref<128x256xbf16, #tpu.memory_space<vmem>>, vector<128x256xbf16>
    %cst_8 = arith.constant dense<0.000000e+00> : vector<8x256xf32>
    %11 = tpu.matmul %9, %10, %cst_8 {dimension_numbers = #tpu.dot_dimension_numbers<[1], [0], [0], [1], [0, 0, 1, 1], [], []>} : vector<8x128xbf16>, vector<128x256xbf16>, vector<8x256xf32> -> vector<8x256xf32>
    %c1 = arith.constant 1 : index
    %c0_9 = arith.constant 0 : index
    %12 = vector.load %arg7[%c1, %c0_9] : memref<8x256xf32, #tpu.memory_space<vmem>>, vector<1x256xf32>
    %13 = vector.broadcast %12 : vector<1x256xf32> to vector<8x256xf32>
    %14 = arith.addf %11, %13 : vector<8x256xf32>
    %cst_10 = arith.constant 0.000000e+00 : f32
    %15 = vector.broadcast %cst_10 : f32 to vector<8x256xf32>
    %16 = arith.maximumf %14, %15 : vector<8x256xf32>
    %17 = arith.truncf %16 : vector<8x256xf32> to vector<8x256xbf16>
    %c0_11 = arith.constant 0 : index
    %c0_12 = arith.constant 0 : index
    %18 = vector.load %arg4[%c0_11, %c0_12] : memref<256x128xbf16, #tpu.memory_space<vmem>>, vector<256x128xbf16>
    %cst_13 = arith.constant dense<0.000000e+00> : vector<8x128xf32>
    %19 = tpu.matmul %17, %18, %cst_13 {dimension_numbers = #tpu.dot_dimension_numbers<[1], [0], [0], [1], [0, 0, 1, 1], [], []>} : vector<8x256xbf16>, vector<256x128xbf16>, vector<8x128xf32> -> vector<8x128xf32>
    %c2 = arith.constant 2 : index
    %c0_14 = arith.constant 0 : index
    %20 = vector.load %arg7[%c2, %c0_14] : memref<8x256xf32, #tpu.memory_space<vmem>>, vector<1x128xf32>
    %21 = vector.broadcast %20 : vector<1x128xf32> to vector<8x128xf32>
    %22 = arith.addf %19, %21 : vector<8x128xf32>
    %cst_15 = arith.constant 0.000000e+00 : f32
    %23 = vector.broadcast %cst_15 : f32 to vector<8x128xf32>
    %24 = arith.maximumf %22, %23 : vector<8x128xf32>
    %25 = arith.truncf %24 : vector<8x128xf32> to vector<8x128xbf16>
    %c0_16 = arith.constant 0 : index
    %c0_17 = arith.constant 0 : index
    %26 = vector.load %arg5[%c0_16, %c0_17] : memref<128x128xbf16, #tpu.memory_space<vmem>>, vector<128x128xbf16>
    %cst_18 = arith.constant dense<0.000000e+00> : vector<8x128xf32>
    %27 = tpu.matmul %25, %26, %cst_18 {dimension_numbers = #tpu.dot_dimension_numbers<[1], [0], [0], [1], [0, 0, 1, 1], [], []>} : vector<8x128xbf16>, vector<128x128xbf16>, vector<8x128xf32> -> vector<8x128xf32>
    %c3 = arith.constant 3 : index
    %c0_19 = arith.constant 0 : index
    %28 = vector.load %arg7[%c3, %c0_19] : memref<8x256xf32, #tpu.memory_space<vmem>>, vector<1x128xf32>
    %29 = vector.broadcast %28 : vector<1x128xf32> to vector<8x128xf32>
    %30 = arith.addf %27, %29 : vector<8x128xf32>
    %cst_20 = arith.constant 0.000000e+00 : f32
    %31 = vector.broadcast %cst_20 : f32 to vector<8x128xf32>
    %32 = arith.maximumf %30, %31 : vector<8x128xf32>
    %33 = arith.truncf %32 : vector<8x128xf32> to vector<8x128xbf16>
    %c0_21 = arith.constant 0 : index
    %c0_22 = arith.constant 0 : index
    %34 = vector.load %arg6[%c0_21, %c0_22] : memref<128x128xbf16, #tpu.memory_space<vmem>>, vector<128x128xbf16>
    %cst_23 = arith.constant dense<0.000000e+00> : vector<8x128xf32>
    %35 = tpu.matmul %33, %34, %cst_23 {dimension_numbers = #tpu.dot_dimension_numbers<[1], [0], [0], [1], [0, 0, 1, 1], [], []>} : vector<8x128xbf16>, vector<128x128xbf16>, vector<8x128xf32> -> vector<8x128xf32>
    %c4 = arith.constant 4 : index
    %c0_24 = arith.constant 0 : index
    %36 = vector.load %arg7[%c4, %c0_24] : memref<8x256xf32, #tpu.memory_space<vmem>>, vector<1x128xf32>
    %37 = vector.broadcast %36 : vector<1x128xf32> to vector<8x128xf32>
    %38 = arith.addf %35, %37 : vector<8x128xf32>
    %c0_25 = arith.constant 0 : index
    %c0_26 = arith.constant 0 : index
    %39 = vector.load %arg8[%c0_25, %c0_26] : memref<8x128xf32, #tpu.memory_space<vmem>>, vector<8x128xf32>
    tpu.vector_store %arg8[%c0_25, %c0_26], %38 {strides = array<i32>} : memref<8x128xf32, #tpu.memory_space<vmem>>, vector<8x128xf32>,
    return
  }
  func.func @transform_0(%arg0: i32) -> (i32, i32) {
    %c0_i32 = arith.constant 0 : i32
    %c0_i32_0 = arith.constant 0 : i32
    return %arg0, %c0_i32 : i32, i32
  }
  func.func @transform_1(%arg0: i32) -> (i32, i32) {
    %c0_i32 = arith.constant 0 : i32
    %c0_i32_0 = arith.constant 0 : i32
    %c0_i32_1 = arith.constant 0 : i32
    return %c0_i32, %c0_i32_0 : i32, i32
  }
  func.func @transform_2(%arg0: i32) -> (i32, i32) {
    %c0_i32 = arith.constant 0 : i32
    %c0_i32_0 = arith.constant 0 : i32
    %c0_i32_1 = arith.constant 0 : i32
    return %c0_i32, %c0_i32_0 : i32, i32
  }
  func.func @transform_3(%arg0: i32) -> (i32, i32) {
    %c0_i32 = arith.constant 0 : i32
    %c0_i32_0 = arith.constant 0 : i32
    %c0_i32_1 = arith.constant 0 : i32
    return %c0_i32, %c0_i32_0 : i32, i32
  }
  func.func @transform_4(%arg0: i32) -> (i32, i32) {
    %c0_i32 = arith.constant 0 : i32
    %c0_i32_0 = arith.constant 0 : i32
    %c0_i32_1 = arith.constant 0 : i32
    return %c0_i32, %c0_i32_0 : i32, i32
  }
  func.func @transform_5(%arg0: i32) -> (i32, i32) {
    %c0_i32 = arith.constant 0 : i32
    %c0_i32_0 = arith.constant 0 : i32
    %c0_i32_1 = arith.constant 0 : i32
    return %c0_i32, %c0_i32_0 : i32, i32
  }
  func.func @transform_6(%arg0: i32) -> (i32, i32) {
    %c0_i32 = arith.constant 0 : i32
    %c0_i32_0 = arith.constant 0 : i32
    %c0_i32_1 = arith.constant 0 : i32
    return %c0_i32, %c0_i32_0 : i32, i32
  }
  func.func @transform_7(%arg0: i32) -> (i32, i32) {
    %c0_i32 = arith.constant 0 : i32
    %c0_i32_0 = arith.constant 0 : i32
    return %arg0, %c0_i32 : i32, i32
  }
}

</mosaic_0001>

<bundles_post_ra>
// kernel: duel_q_forward.1
= control target key start
LH: loop header
LB: loop body
LE: loop exit
PB: predicated region body
PF: predicated region fallthrough
CT: control target
= control target key end

     0   :  { %12 = vsyncpa [#allocation3], 0  ;;  %s1091_s0 = inlined_call_operand.vmem [shape: f32[8,8], index: 0, kind: input, shape index: {}]   ;;  %s1092_s1 = inlined_call_operand.vmem [shape: bf16[8,128], index: 1, kind: input, shape index: {}]   ;;  %s1093_s2 = inlined_call_operand.hbm [shape: bf16[128,256], index: 2, kind: input, shape index: {}]   ;;  %s1094_s3 = inlined_call_operand.hbm [shape: bf16[256,128], index: 3, kind: input, shape index: {}]   ;;  %s1095_s4 = inlined_call_operand.hbm [shape: bf16[128,128], index: 4, kind: input, shape index: {}]   ;;  %s1096_s5 = inlined_call_operand.hbm [shape: bf16[128,128], index: 5, kind: input, shape index: {}]   ;;  %s1097_s6 = inlined_call_operand.vmem [shape: f32[8,256], index: 6, kind: input, shape index: {}]   ;;  %s1098_s7 = inlined_call_operand.vmem [shape: f32[8,128], index: 7, kind: output, shape index: {}]  }
   0x1   :  { %13 = vsyncpa [#allocation5], 0 }
   0x2   :  { %14 = vsyncpa [#allocation8], 0  ;;  %s972_s24 = smov [#allocation4]  }
   0x3   :  { %s36_s25 = sshll.u32 %s972_s24, 4  ;;  %s37_s25 = int_to_ptr.vmem [resolvable:$true] %s36_s25 }
   0x4   :  { %s894_s26 = scalar_lea.vmem %s37_s25, 2048  ;;  %p899_p1 = scmp.lt.s32.totalorder %s37_s25, %s37_s25 }
   0x5   :  { %p895_p0 = scmp.ne.s32.totalorder %s37_s25, %s894_s26  ;;  %p900_p2 = scmp.lt.s32.totalorder %s894_s26, %s894_s26 }
   0x7   :  { %p901_p3 = por %p900_p2, %p899_p1 }
   0x9   :  { %p902_p4 = pnand %p901_p3, %p895_p0 }
   0xb   :  { %905 = shalt.err (!%p902_p4)
}
   0xc   :  { %s973_s27 = smov 64   ;;  %s974_s28 = smov 4  }
   0xd   :  { %42 = dma.hbm_to_vmem [thread:$0]  %s1094_s3, 2048, %s37_s25, [#allocation5], %s973_s27, %s973_s27, %s974_s28  }
   0xe   :  { %s975_s8 = smov [#allocation2]  }
   0xf   :  { %s24_s9 = sshll.u32 %s975_s8, 4  ;;  %s25_s9 = int_to_ptr.vmem [resolvable:$true] %s24_s9 }
  0x10   :  { %s914_s10 = scalar_lea.vmem %s25_s9, 2048  ;;  %p919_p6 = scmp.lt.s32.totalorder %s25_s9, %s25_s9 }
  0x11   :  { %p915_p5 = scmp.ne.s32.totalorder %s25_s9, %s914_s10  ;;  %p920_p7 = scmp.lt.s32.totalorder %s914_s10, %s914_s10 }
  0x13   :  { %p921_p8 = por %p920_p7, %p919_p6 }
  0x15   :  { %p922_p9 = pnand %p921_p8, %p915_p5 }
  0x17   :  { %925 = shalt.err (!%p922_p9)
}
  0x18   :  { %s976_s11 = smov 128   ;;  %s977_s12 = smov 8  }
  0x19   :  { %30 = dma.hbm_to_vmem [thread:$0]  %s1093_s2, 2048, %s25_s9, [#allocation3], %s976_s11, %s976_s11, %s977_s12  }
  0x1a   :  { %s978_s15 = smov [#allocation6]   ;;  %s979_s17 = smov [#allocation7]  }
  0x1b   :  { %s48_s16 = sshll.u32 %s978_s15, 4  ;;  %s60_s3 = sshll.u32 %s979_s17, 4  ;;  %s49_s16 = int_to_ptr.vmem [resolvable:$true] %s48_s16  ;;  %s61_s3 = int_to_ptr.vmem [resolvable:$true] %s60_s3 }
  0x1c   :  { %s934_s18 = scalar_lea.vmem %s49_s16, 1024  ;;  %p939_p11 = scmp.lt.s32.totalorder %s49_s16, %s49_s16 }
  0x1d   :  { %p935_p10 = scmp.ne.s32.totalorder %s49_s16, %s934_s18  ;;  %p940_p12 = scmp.lt.s32.totalorder %s934_s18, %s934_s18 }
  0x1f   :  { %p941_p13 = por %p940_p12, %p939_p11 }
  0x21   :  { %p942_p0 = pnand %p941_p13, %p935_p10 }
  0x23   :  { %945 = shalt.err (!%p942_p0)
}
  0x24   :  { %54 = dma.hbm_to_vmem [thread:$0]  %s1095_s4, 1024, %s49_s16, [#allocation5], %s973_s27, %s973_s27, %s974_s28  }
  0x25   :  { %s954_s2 = scalar_lea.vmem %s61_s3, 1024  ;;  %p959_p2 = scmp.lt.s32.totalorder %s61_s3, %s61_s3 }
  0x26   :  { %p955_p1 = scmp.ne.s32.totalorder %s61_s3, %s954_s2  ;;  %p960_p3 = scmp.lt.s32.totalorder %s954_s2, %s954_s2 }
  0x28   :  { %p961_p4 = por %p960_p3, %p959_p2 }
  0x2a   :  { %p962_p5 = pnand %p961_p4, %p955_p1 }
  0x2c   :  { %965 = shalt.err (!%p962_p5)
}
  0x2d   :  { %66 = dma.hbm_to_vmem [thread:$0]  %s1096_s5, 1024, %s61_s3, [#allocation8], %s973_s27, %s973_s27, %s974_s28  }
  0x2e   :  { %966 = dma.done.wait [#allocation3], 2048  }
  0x2f   :  { %967 = vsyncadd [#allocation3], 4294965248 }
  0x30   :  { %968 = dma.done.wait [#allocation5], 3072  }
  0x31   :  { %969 = vsyncadd [#allocation5], 4294964224 }
  0x32   :  { %970 = dma.done.wait [#allocation8], 1024  }
  0x33   :  { %971 = vsyncadd [#allocation8], 4294966272  ;;  %v980_v0 = vmov 0.0   ;;  %vm981_vm0 = vmmov 0   ;;  %vm90_vm1 = vcmask 1043456   ;;  %v82_v2 = vld [vmem:[%s1091_s0] sm:$0xff]  ;;  %v155_v51 = vlaneseq }
  0x34   :  { %773 = vmatprep.subr.bf16.mxu0 %v980_v0  ;;  %775 = vmatprep.mubr.msk.bf16.mxu0 %vm981_vm0, %v980_v0  ;;  %v84_v1 = vld [vmem:[%s1092_s1] sm:$0xf]  ;;  %v83_v4 = vpack.c.bf16 %v82_v2, %v82_v2  ;;  %v830_v5 = vld [vmem:[#allocation2 + $0x74] ss:$8 sps:$4 sm:$0xff]   ;;  %v832_v6 = vld [vmem:[#allocation2 + $0x70] ss:$8 sps:$4 sm:$0xff]  }
  0x35   :  { %v92_v3 = vsel %vm90_vm1, %v84_v1, 0  ;;  %vm86_vm2 = vcmask 64512   ;;  %v833_v7 = vld [vmem:[#allocation2 + $0x64] ss:$8 sps:$4 sm:$0xff]   ;;  %245 = vmatprep.subr.bf16.mxu1 %v830_v5  ;;  %v835_v8 = vld [vmem:[#allocation2 + $0x60] ss:$8 sps:$4 sm:$0xff]  }
  0x36   :  { %774 = vmatpush3.bf16.msra.mxu0 %v92_v3  ;;  %246 = vmatpush1.bf16.msra.mxu1 %v832_v6  ;;  %v836_v9 = vld [vmem:[#allocation2 + $0x54] ss:$8 sps:$4 sm:$0xff]   ;;  %v838_v10 = vld [vmem:[#allocation2 + $0x50] ss:$8 sps:$4 sm:$0xff]   ;;  %v839_v11 = vld [vmem:[#allocation2 + $0x44] ss:$8 sps:$4 sm:$0xff]  }
  0x37   :  { %247 = vmatprep.subr.bf16.mxu1 %v833_v7  ;;  %v841_v12 = vld [vmem:[#allocation2 + $0x40] ss:$8 sps:$4 sm:$0xff]   ;;  %v842_v13 = vld [vmem:[#allocation2 + $0x34] ss:$8 sps:$4 sm:$0xff]   ;;  %v844_v14 = vld [vmem:[#allocation2 + $0x30] ss:$8 sps:$4 sm:$0xff]  }
  0x38   :  { %v845_v15 = vld [vmem:[#allocation2 + $0x24] ss:$8 sps:$4 sm:$0xff]   ;;  %v847_v16 = vld [vmem:[#allocation2 + $0x20] ss:$8 sps:$4 sm:$0xff]   ;;  %v848_v17 = vld [vmem:[#allocation2 + $0x14] ss:$8 sps:$4 sm:$0xff]  }
  0x39   :  { %776 = vmatmul.mubr.msk.bf16.vlgmr.msra.gmra.mxu0 %vm86_vm2, %v83_v4  ;;  %v850_v18 = vld [vmem:[#allocation2 + $0x10] ss:$8 sps:$4 sm:$0xff]   ;;  %v851_v19 = vld [vmem:[#allocation2 + $0x4] ss:$8 sps:$4 sm:$0xff]   ;;  %v853_v20 = vld [vmem:[#allocation2] ss:$8 sps:$4 sm:$0xff]  }
  0x3a   :  { %248 = vmatpush1.bf16.msra.mxu1 %v835_v8  ;;  %v982_v21 = vmov 0   ;;  %v854_v22 = vld [vmem:[#allocation4 + $0x78] sm:$0xff]   ;;  %v856_v24 = vld [vmem:[#allocation4 + $0x70] sm:$0xff]   ;;  %v858_v26 = vld [vmem:[#allocation4 + $0x68] sm:$0xff]   ;;  %v156_v52 = vshrl.u32 %v155_v51, 7 }
  0x3b   :  { %249 = vmatprep.subr.bf16.mxu1 %v836_v9  ;;  %277 = vmatprep.mubr.bf16.mxu1 %v982_v21  ;;  %v855_v23 = vld [vmem:[#allocation4 + $0x38] sm:$0xff]   ;;  %v857_v25 = vld [vmem:[#allocation4 + $0x30] sm:$0xff]   ;;  %v859_v27 = vld [vmem:[#allocation4 + $0x28] sm:$0xff]  }
  0x3c   :  { %733 = vmatprep.subr.bf16.mxu0 %v854_v22  ;;  %v860_v28 = vld [vmem:[#allocation4 + $0x60] sm:$0xff]   ;;  %v862_v30 = vld [vmem:[#allocation4 + $0x58] sm:$0xff]   ;;  %v864_v32 = vld [vmem:[#allocation4 + $0x50] sm:$0xff]   ;;  %v157_v53 = vsub.s32 0, %v156_v52  ;;  %v161_v55 = vsub.s32 1, %v156_v52 }
  0x3d   :  { %734 = vmatpush3.bf16.msra.mxu0 %v855_v23  ;;  %v861_v29 = vld [vmem:[#allocation4 + $0x20] sm:$0xff]   ;;  %v863_v31 = vld [vmem:[#allocation4 + $0x18] sm:$0xff]   ;;  %v865_v33 = vld [vmem:[#allocation4 + $0x10] sm:$0xff]  }
  0x3e   :  { %250 = vmatpush1.bf16.msra.mxu1 %v838_v10  ;;  %735 = vmatprep.subr.bf16.mxu0 %v856_v24  ;;  %v85_v34 = vld [vmem:[%s1097_s6] ss:$0 sm:$0xff]  ;;  %v866_v42 = vld [vmem:[#allocation4 + $0x48] sm:$0xff]   ;;  %v870_v46 = vld [vmem:[#allocation6 + $0x38] sm:$0xff]  }
  0x3f   :  { %251 = vmatprep.subr.bf16.mxu1 %v839_v11  ;;  %v867_v43 = vld [vmem:[#allocation4 + $0x8] sm:$0xff]   ;;  %v868_v44 = vld [vmem:[#allocation4 + $0x40] sm:$0xff]   ;;  %v871_v47 = vld [vmem:[#allocation6 + $0x30] sm:$0xff]  }
  0x40   :  { %v869_v45 = vld [vmem:[#allocation4] sm:$0xff]   ;;  %v872_v48 = vld [vmem:[#allocation6 + $0x28] sm:$0xff]   ;;  %v874_v50 = vld [vmem:[#allocation6 + $0x18] sm:$0xff]  }
  0x41   :  { %736 = vmatpush3.bf16.msra.mxu0 %v857_v25  ;;  %v873_v49 = vld [vmem:[#allocation6 + $0x20] sm:$0xff]   ;;  %v875_v5 = vld [vmem:[#allocation6 + $0x10] sm:$0xff]   ;;  %v876_v6 = vld [vmem:[#allocation6 + $0x8] sm:$0xff]  }
  0x42   :  { %252 = vmatpush1.bf16.msra.mxu1 %v841_v12  ;;  %737 = vmatprep.subr.bf16.mxu0 %v858_v26  ;;  %v682_v54 = vld [vmem:[%s1097_s6 + $0x1] ss:$8 sm:$0x3]  ;;  %v878_v8 = vld [vmem:[#allocation7 + $0x38] sm:$0xff]   ;;  %v879_v9 = vld [vmem:[#allocation7 + $0x30] sm:$0xff]  }
  0x43   :  { %253 = vmatprep.subr.bf16.mxu1 %v842_v13  ;;  %v158_v56 = vrot.slane %v682_v54, %v157_v53  ;;  %v162_v57 = vrot.slane %v682_v54, %v161_v55  ;;  %v877_v7 = vld [vmem:[#allocation6] sm:$0xff]   ;;  %v880_v10 = vld [vmem:[#allocation7 + $0x28] sm:$0xff]   ;;  %v882_v12 = vld [vmem:[#allocation7 + $0x18] sm:$0xff]  }
  0x44   :  { %v881_v11 = vld [vmem:[#allocation7 + $0x20] sm:$0xff]   ;;  %v883_v13 = vld [vmem:[#allocation7 + $0x10] sm:$0xff]   ;;  %v884_v23 = vld [vmem:[#allocation7 + $0x8] sm:$0xff]  }
  0x45   :  { %738 = vmatpush3.bf16.msra.mxu0 %v859_v27  ;;  %v885_v24 = vld [vmem:[#allocation7] sm:$0xff]  }
  0x46   :  { %254 = vmatpush1.bf16.msra.mxu1 %v844_v14  ;;  %739 = vmatprep.subr.bf16.mxu0 %v860_v28  ;;  %v477_v25 = vld [vmem:[%s1097_s6 + $0x3] ss:$0 sm:$0xff] }
  0x47   :  { %255 = vmatprep.subr.bf16.mxu1 %v845_v15  ;;  %v322_v15 = vld [vmem:[%s1097_s6 + $0x2] ss:$0 sm:$0xff] }
  0x49   :  { %740 = vmatpush3.bf16.msra.mxu0 %v861_v29 }
  0x4a   :  { %256 = vmatpush1.bf16.msra.mxu1 %v847_v16  ;;  %741 = vmatprep.subr.bf16.mxu0 %v862_v30 }
  0x4b   :  { %257 = vmatprep.subr.bf16.mxu1 %v848_v17 }
  0x4d   :  { %742 = vmatpush3.bf16.msra.mxu0 %v863_v31 }
  0x4e   :  { %258 = vmatpush1.bf16.msra.mxu1 %v850_v18  ;;  %743 = vmatprep.subr.bf16.mxu0 %v864_v32 }
  0x4f   :  { %259 = vmatprep.subr.bf16.mxu1 %v851_v19 }
  0x51   :  { %744 = vmatpush3.bf16.msra.mxu0 %v865_v33  ;;  %v584_v33 = vld [vmem:[%s1097_s6 + $0x4] ss:$0 sm:$0xff] }
  0x52   :  { %260 = vmatpush1.bf16.msra.mxu1 %v853_v20  ;;  %745 = vmatprep.subr.bf16.mxu0 %v866_v42 }
  0x53   :  { %779 = vmatprep.subr.bf16.mxu1 %v980_v0 }
  0x55   :  { %746 = vmatpush3.bf16.msra.mxu0 %v867_v43 }
  0x56   :  { %747 = vmatprep.subr.bf16.mxu0 %v868_v44 }
  0x59   :  { %748 = vmatpush3.bf16.msra.mxu0 %v869_v45 }
  0x5a   :  { %799 = vmatprep.subr.bf16.mxu0 %v980_v0 }
  0xf9   :  { %v128_v35 = vpop.f32.mrf.mxu0 }
  0xfa   :  { %v129_v36 = vadd.f32 %v128_v35, %v85_v34 }
  0xfb   :  { %v777_v37 = vpop.f32.mrf.mxu0 }
  0xfc   :  { %v134_v38 = vmax.f32 %v129_v36, 0.0 }
  0xfd   :  { %v131_v39 = vpop.f32.mrf.mxu0 }
  0xfe   :  { %v135_v40 = vpack.c.bf16 %v134_v38, %v134_v38 }
  0xff   :  { %v778_v41 = vpop.f32.mrf.mxu0 }
 0x100   :  { %278 = vmatmul.mubr.bf16.vlgmr.msra.gmra.mxu1 %v135_v40 }
 0x101   :  { %795 = vmatprep.mubr.msk.bf16.mxu1 %vm981_vm0, %v980_v0  ;;  %780 = vmatpush3.bf16.msra.mxu1 %v870_v46 }
 0x102   :  { %781 = vmatprep.subr.bf16.mxu1 %v980_v0 }
 0x105   :  { %782 = vmatpush3.bf16.msra.mxu1 %v871_v47 }
 0x106   :  { %783 = vmatprep.subr.bf16.mxu1 %v980_v0 }
 0x109   :  { %784 = vmatpush3.bf16.msra.mxu1 %v872_v48 }
 0x10a   :  { %785 = vmatprep.subr.bf16.mxu1 %v980_v0 }
 0x10d   :  { %786 = vmatpush3.bf16.msra.mxu1 %v873_v49 }
 0x10e   :  { %787 = vmatprep.subr.bf16.mxu1 %v980_v0 }
 0x111   :  { %788 = vmatpush3.bf16.msra.mxu1 %v874_v50 }
 0x112   :  { %789 = vmatprep.subr.bf16.mxu1 %v980_v0 }
 0x115   :  { %790 = vmatpush3.bf16.msra.mxu1 %v875_v5 }
 0x116   :  { %791 = vmatprep.subr.bf16.mxu1 %v980_v0 }
 0x119   :  { %792 = vmatpush3.bf16.msra.mxu1 %v876_v6 }
 0x11a   :  { %793 = vmatprep.subr.bf16.mxu1 %v980_v0 }
 0x11d   :  { %794 = vmatpush3.bf16.msra.mxu1 %v877_v7 }
 0x1c0   :  { %v279_v58 = vpop.f32.mrf.mxu1 }
 0x1c1   :  { %v280_v59 = vadd.f32 %v279_v58, %v158_v56 }
 0x1c2   :  { %v281_v60 = vpop.f32.mrf.mxu1 }
 0x1c3   :  { %v282_v61 = vadd.f32 %v281_v60, %v162_v57  ;;  %v286_v62 = vmax.f32 %v280_v59, 0.0 }
 0x1c4   :  { %v283_v63 = vpop.f32.mrf.mxu1 }
 0x1c5   :  { %v287_v1 = vmax.f32 %v282_v61, 0.0  ;;  %v288_v4 = vpack.c.bf16 %v286_v62, %v286_v62 }
 0x1c6   :  { %v284_v2 = vpop.f32.mrf.mxu1 }
 0x1c7   :  { %v289_v3 = vpack.c.bf16 %v287_v1, %v287_v1 }
 0x1c9   :  { %451 = vmatprep.mubr.bf16.mxu0 %v289_v3 }
 0x1ca   :  { %452 = vmatmul.mubr.bf16.vlgmr.msra.gmra.mxu0 %v288_v4 }
 0x1cb   :  { %815 = vmatprep.mubr.msk.bf16.mxu0 %vm981_vm0, %v980_v0  ;;  %800 = vmatpush3.bf16.msra.mxu0 %v878_v8 }
 0x1cc   :  { %801 = vmatprep.subr.bf16.mxu0 %v980_v0 }
 0x1cf   :  { %802 = vmatpush3.bf16.msra.mxu0 %v879_v9 }
 0x1d0   :  { %803 = vmatprep.subr.bf16.mxu0 %v980_v0 }
 0x1d3   :  { %804 = vmatpush3.bf16.msra.mxu0 %v880_v10 }
 0x1d4   :  { %805 = vmatprep.subr.bf16.mxu0 %v980_v0 }
 0x1d7   :  { %806 = vmatpush3.bf16.msra.mxu0 %v881_v11 }
 0x1d8   :  { %807 = vmatprep.subr.bf16.mxu0 %v980_v0 }
 0x1db   :  { %808 = vmatpush3.bf16.msra.mxu0 %v882_v12 }
 0x1dc   :  { %809 = vmatprep.subr.bf16.mxu0 %v980_v0 }
 0x1df   :  { %810 = vmatpush3.bf16.msra.mxu0 %v883_v13 }
 0x1e0   :  { %811 = vmatprep.subr.bf16.mxu0 %v980_v0 }
 0x1e3   :  { %812 = vmatpush3.bf16.msra.mxu0 %v884_v23 }
 0x1e4   :  { %813 = vmatprep.subr.bf16.mxu0 %v980_v0 }
 0x1e7   :  { %814 = vmatpush3.bf16.msra.mxu0 %v885_v24 }
 0x28a   :  { %v749_v14 = vpop.f32.mrf.mxu0 }
 0x28c   :  { %v750_v16 = vpop.f32.mrf.mxu0 }
 0x28d   :  { %v751_v17 = vadd.f32 %v750_v16, %v749_v14 }
 0x28e   :  { %v752_v18 = vpop.f32.mrf.mxu0 }
 0x28f   :  { %v454_v19 = vadd.f32 %v751_v17, %v322_v15 }
 0x290   :  { %v753_v20 = vpop.f32.mrf.mxu0 }
 0x291   :  { %v459_v21 = vmax.f32 %v454_v19, 0.0 }
 0x293   :  { %v460_v22 = vpack.c.bf16 %v459_v21, %v459_v21 }
 0x295   :  { %796 = vmatmul.mubr.bf16.vlgmr.msra.gmra.mxu1 %v460_v22 }
 0x355   :  { %v560_v26 = vpop.f32.mrf.mxu1 }
 0x356   :  { %v561_v27 = vadd.f32 %v560_v26, %v477_v25 }
 0x357   :  { %v797_v28 = vpop.f32.mrf.mxu1 }
 0x358   :  { %v566_v29 = vmax.f32 %v561_v27, 0.0 }
 0x359   :  { %v563_v30 = vpop.f32.mrf.mxu1 }
 0x35a   :  { %v567_v31 = vpack.c.bf16 %v566_v29, %v566_v29 }
 0x35b   :  { %v798_v32 = vpop.f32.mrf.mxu1 }
 0x35c   :  { %816 = vmatmul.mubr.bf16.vlgmr.msra.gmra.mxu0 %v567_v31 }
 0x41c   :  { %v667_v34 = vpop.f32.mrf.mxu0 }
 0x41d   :  { %v668_v0 = vadd.f32 %v667_v34, %v584_v33 }
 0x41e   :  { %v817_v35 = vpop.f32.mrf.mxu0 }
 0x41f   :  { %673 = vst [vmem:[%s1098_s7] sm:$0xff] %v668_v0 }
 0x420   :  { %v670_v36 = vpop.f32.mrf.mxu0 }
 0x422   :  { %v818_v37 = vpop.f32.mrf.mxu0 }
 0x423   :  { %678 = vsyncpa [#allocation3], 1 }
 0x424   :  { %679 = vsyncpa [#allocation5], 1 }
 0x425   :  { %680 = vsyncpa [#allocation8], 1 }

</bundles_post_ra>
